<compile_context>
chip_gen: v5e
topology: v5e:2x2
jax: 0.10.0
libtpu: 0.0.40
codegen_flags: <defaults>
</compile_context>

<pallas_src>
import math
import jax
import jax.numpy as jnp
from jax.experimental import pallas as pl
from jax.experimental.pallas import tpu as pltpu

# ---- small config consistent with Block.__init__ ----
DIM = 32
N_HEADS = 4
N_KV_HEADS = 2
HEAD_DIM = 8
HIDDEN_DIM = 64
MAX_BATCH = 2
MAX_SEQ = 16
NORM_EPS = 1e-5
ROPE_THETA = 500000.0

B = 2
S = 8
START_POS = 0                 # prefill
QF = N_HEADS * HEAD_DIM       # 32
KF = N_KV_HEADS * HEAD_DIM    # 16
QKVF = QF + 2 * KF            # 64
REP = N_HEADS // N_KV_HEADS   # 2
BS = B * S

# Row-concat fusion of the "up" weights requires both projections to share a
# column width (true for this config: 2*QKVF == 2*HIDDEN_DIM == 128).
assert 2 * QKVF == 2 * HIDDEN_DIM

# TODO(synk): decode path (start_pos not a multiple of S, attention over the
# cached prefix) needs a scalar-prefetched start_pos driving the cache
# index_map; only the standard prefill hot path is implemented here.


def _block_kernel(x_ref, w_up_ref, w_down_ref, n12_ref, cs_ref, mask_ref,
                  ck_hbm_ref, cv_hbm_ref, out_ref, knew_ref, vnew_ref):
    del ck_hbm_ref, cv_hbm_ref          # aliased cache buffers (written via knew/vnew blocks)
    f32, bf16 = jnp.float32, jnp.bfloat16
    x = x_ref[...]                      # (S, DIM) f32, this batch's tokens
    nw = n12_ref[...]                   # (2, DIM)  [input_ln | post_attn_ln]
    w_up = w_up_ref[...]                # (2*DIM, 128) bf16  [wqkv+swap ; w1|w3]
    w_dn = w_down_ref[...]              # (QF+HIDDEN, DIM) bf16  [wo ; w2]
    w_qkv, w_13 = w_up[:DIM], w_up[DIM:]
    wo, w2 = w_dn[:QF], w_dn[QF:]

    def rmsnorm(v, w):                  # fp32 statistics
        ms = jnp.mean(v * v, axis=-1, keepdims=True)
        return v * jax.lax.rsqrt(ms + NORM_EPS) * w

    # ---------------- attention ----------------
    xn = rmsnorm(x, nw[0:1])
    # Fused q|k|v projection, 128 lanes wide; columns [QKVF:QKVF+QF+KF) hold
    # the pair-swapped q|k copy so RoPE needs no in-kernel lane permutation.
    proj = jnp.dot(xn.astype(bf16), w_qkv, preferred_element_type=f32)   # (S, 128)
    # RoPE: full-lane multiply by the packed [cos | sin] table, then fold the
    # sin half onto the cos half with an XLU lane roll (no paired 64-lane slices).
    t = proj * cs_ref[...]
    qkv = t + pltpu.roll(t, shift=QKVF, axis=1)     # cols [0:QKVF) = rot q | rot k | v

    # KV-cache writeback: one slab store per cache tensor for this batch.
    knew_ref[0] = qkv[:, QF:QF + KF]
    vnew_ref[0] = qkv[:, QF + KF:QKVF]

    # GQA grouping: per kv-group, the REP query heads are stacked along rows;
    # k/v are NOT duplicated across query heads.
    qh = [qkv[:, h * HEAD_DIM:(h + 1) * HEAD_DIM] for h in range(N_HEADS)]
    q_g = jnp.stack([jnp.concatenate(qh[g * REP:(g + 1) * REP], axis=0)
                     for g in range(N_KV_HEADS)], axis=0)                # (G, REP*S, hd)
    k_g = jnp.stack([qkv[:, QF + g * HEAD_DIM:QF + (g + 1) * HEAD_DIM]
                     for g in range(N_KV_HEADS)], axis=0)                # (G, S, hd)
    v_g = jnp.stack([qkv[:, QF + KF + g * HEAD_DIM:QF + KF + (g + 1) * HEAD_DIM]
                     for g in range(N_KV_HEADS)], axis=0)                # (G, S, hd)

    s = jnp.einsum("gqd,gkd->gqk", q_g.astype(bf16), k_g.astype(bf16),
                   preferred_element_type=f32)                           # (G, REP*S, S)
    s = s * (1.0 / math.sqrt(HEAD_DIM)) + mask_ref[...][None]            # causal mask
    m = jnp.max(s, axis=-1, keepdims=True)
    e = jnp.exp(s - m)
    p = e * pl.reciprocal(jnp.sum(e, axis=-1, keepdims=True), approx=True)
    attn = jnp.einsum("gqk,gkd->gqd", p.astype(bf16), v_g.astype(bf16),
                      preferred_element_type=f32)                        # (G, REP*S, hd)

    # Re-pack attn once to a head-major (S, QF) slab, then a single K=QF
    # output projection matmul.
    attn_2d = jnp.concatenate(
        [attn[g, r * S:(r + 1) * S, :]
         for g in range(N_KV_HEADS) for r in range(REP)], axis=-1)       # (S, QF)
    o = jnp.dot(attn_2d.astype(bf16), wo, preferred_element_type=f32)    # (S, DIM)
    h1 = x + o

    # ---------------- feed-forward (SwiGLU) ----------------
    hn = rmsnorm(h1, nw[1:2])
    gu = jnp.dot(hn.astype(bf16), w_13, preferred_element_type=f32)      # (S, 2*HIDDEN)
    # g/u split via XLU roll: low HIDDEN lanes of gu*roll(gu) are g*u.
    prod = gu * pltpu.roll(gu, shift=HIDDEN_DIM, axis=1)
    act = prod * pl.reciprocal(1.0 + jnp.exp(-gu), approx=True)          # silu(g)*u on low half
    f = jnp.dot(act[:, :HIDDEN_DIM].astype(bf16), w2, preferred_element_type=f32)

    out_ref[...] = h1 + f               # (S, DIM)


# ---------------- host-side table / weight prep ----------------
def rope_half_tables(start_pos, seqlen):
    pos = jnp.arange(start_pos, start_pos + seqlen, dtype=jnp.float32)
    inv_freq = 1.0 / (ROPE_THETA ** (jnp.arange(0, HEAD_DIM, 2, dtype=jnp.float32) / HEAD_DIM))
    freqs = pos[:, None] * inv_freq[None, :]                # (S, hd/2)
    return jnp.cos(freqs), jnp.sin(freqs)


def rope_cos_sin_table(start_pos, seqlen):
    """Packed (S, 2*QKVF) [cos | sin] table matched to the fused qkv columns."""
    cos_half, sin_half = rope_half_tables(start_pos, seqlen)
    cos_hd = jnp.repeat(cos_half, 2, axis=-1)               # [c0,c0,c1,c1,...]
    sign = jnp.tile(jnp.array([-1.0, 1.0], jnp.float32), HEAD_DIM // 2)
    sin_hd = jnp.repeat(sin_half, 2, axis=-1) * sign        # [-s0,+s0,-s1,+s1,...]
    cos_cols = jnp.concatenate(
        [jnp.tile(cos_hd, (1, N_HEADS)), jnp.tile(cos_hd, (1, N_KV_HEADS)),
         jnp.ones((seqlen, KF), jnp.float32)], axis=1)      # q | k | v(=1)
    sin_cols = jnp.concatenate(
        [jnp.tile(sin_hd, (1, N_HEADS)), jnp.tile(sin_hd, (1, N_KV_HEADS)),
         jnp.zeros((seqlen, KF), jnp.float32)], axis=1)     # q | k | pad(=0)
    return jnp.concatenate([cos_cols, sin_cols], axis=1)    # (S, 2*QKVF)


def block_forward(x, params, start_pos, mask, cache_k, cache_v):
    wq, wk, wv, wo, w1, w2, w3, n1, n2 = params

    # ---- host-side (free) weight repacking ----
    # qkv-proj columns: [q | k | v | q_pairswap | k_pairswap | zeros]; the
    # swapped halves feed the RoPE sin lanes, the zero tail is multiplied by 0.
    wqkv = jnp.concatenate([wq, wk, wv], axis=1)                         # (DIM, QKVF)
    swap = jnp.arange(QF + KF) ^ 1                                       # adjacent-pair swap
    wqk_sw = jnp.concatenate([wq, wk], axis=1)[:, swap]                  # (DIM, QF+KF)
    w_qkv_big = jnp.concatenate(
        [wqkv, wqk_sw, jnp.zeros((DIM, KF), jnp.float32)], axis=1)       # (DIM, 2*QKVF)
    w13 = jnp.concatenate([w1, w3], axis=1)                              # (DIM, 2*HIDDEN)
    # Fused operand blocks: fewer, bigger pre-grid DMAs.
    w_up = jnp.concatenate([w_qkv_big, w13], axis=0).astype(jnp.bfloat16)    # (2*DIM, 128)
    w_down = jnp.concatenate([wo, w2], axis=0).astype(jnp.bfloat16)          # (QF+HID, DIM)
    n12 = jnp.concatenate([n1, n2], axis=0)                              # (2, DIM)

    cs = rope_cos_sin_table(start_pos, S)                                # (S, 128)
    mask_g = jnp.tile(mask.astype(jnp.float32), (REP, 1))                # (REP*S, S)

    x2d = x.reshape(BS, DIM)
    seq_block = start_pos // S   # TODO(synk): requires start_pos % S == 0 (prefill)

    out2d, new_k, new_v = pl.pallas_call(
        _block_kernel,
        grid=(B,),
        in_specs=[
            pl.BlockSpec((S, DIM), lambda b: (b, 0)),                    # x (this batch)
            pl.BlockSpec((2 * DIM, 2 * QKVF), lambda b: (0, 0)),         # wqkv+swap | w1|w3
            pl.BlockSpec((QF + HIDDEN_DIM, DIM), lambda b: (0, 0)),      # wo | w2
            pl.BlockSpec((2, DIM), lambda b: (0, 0)),                    # norm weights
            pl.BlockSpec((S, 2 * QKVF), lambda b: (0, 0)),               # cos|sin table
            pl.BlockSpec((REP * S, S), lambda b: (0, 0)),                # causal mask
            pl.BlockSpec(memory_space=pl.ANY),                           # cache_k (aliased)
            pl.BlockSpec(memory_space=pl.ANY),                           # cache_v (aliased)
        ],
        out_specs=(
            pl.BlockSpec((S, DIM), lambda b: (b, 0)),
            pl.BlockSpec((1, S, KF), lambda b: (b, seq_block, 0)),
            pl.BlockSpec((1, S, KF), lambda b: (b, seq_block, 0)),
        ),
        out_shape=(
            jax.ShapeDtypeStruct((BS, DIM), jnp.float32),
            jax.ShapeDtypeStruct(cache_k.shape, cache_k.dtype),
            jax.ShapeDtypeStruct(cache_v.shape, cache_v.dtype),
        ),
        input_output_aliases={6: 1, 7: 2},
        compiler_params=pltpu.CompilerParams(dimension_semantics=("parallel",)),
    )(x2d, w_up, w_down, n12, cs, mask_g, cache_k, cache_v)

    return out2d.reshape(B, S, DIM), new_k, new_v


# ---------------- pure-JAX reference (ground truth) ----------------
def _rope_ref(t, cos_half, sin_half):
    Bn, Sn, F = t.shape
    nh = F // HEAD_DIM
    tr = t.reshape(Bn, Sn, nh, HEAD_DIM // 2, 2)
    te, to = tr[..., 0], tr[..., 1]
    c = cos_half[None, :, None, :]
    s = sin_half[None, :, None, :]
    oe = te * c - to * s
    oo = te * s + to * c
    return jnp.stack([oe, oo], axis=-1).reshape(Bn, Sn, F)


def reference_block(x, params, mask, cos_half, sin_half):
    wq, wk, wv, wo, w1, w2, w3, n1, n2 = params

    def rms(v, w):
        return v * jax.lax.rsqrt(jnp.mean(v * v, -1, keepdims=True) + NORM_EPS) * w

    xn = rms(x, n1)
    q = _rope_ref(xn @ wq, cos_half, sin_half)
    k = _rope_ref(xn @ wk, cos_half, sin_half)
    v = xn @ wv
    qh = q.reshape(B, S, N_HEADS, HEAD_DIM)
    kh = jnp.repeat(k.reshape(B, S, N_KV_HEADS, HEAD_DIM), REP, axis=2)
    vh = jnp.repeat(v.reshape(B, S, N_KV_HEADS, HEAD_DIM), REP, axis=2)
    scores = jnp.einsum("bqhd,bkhd->bhqk", qh, kh) / math.sqrt(HEAD_DIM) + mask
    p = jax.nn.softmax(scores, axis=-1)
    attn = jnp.einsum("bhqk,bkhd->bqhd", p, vh).reshape(B, S, QF)
    h1 = x + attn @ wo
    hn = rms(h1, n2)
    return h1 + (jax.nn.silu(hn @ w1) * (hn @ w3)) @ w2


if __name__ == "__main__":
    key = jax.random.PRNGKey(0)
    ks = jax.random.split(key, 9)
    scale = 0.02
    params = (
        scale * jax.random.normal(ks[0], (DIM, QF), jnp.float32),          # wq
        scale * jax.random.normal(ks[1], (DIM, KF), jnp.float32),          # wk
        scale * jax.random.normal(ks[2], (DIM, KF), jnp.float32),          # wv
        scale * jax.random.normal(ks[3], (QF, DIM), jnp.float32),          # wo
        scale * jax.random.normal(ks[4], (DIM, HIDDEN_DIM), jnp.float32),  # w1 (gate)
        scale * jax.random.normal(ks[5], (HIDDEN_DIM, DIM), jnp.float32),  # w2 (down)
        scale * jax.random.normal(ks[6], (DIM, HIDDEN_DIM), jnp.float32),  # w3 (up)
        jnp.ones((1, DIM), jnp.float32),                                   # input_layernorm
        jnp.ones((1, DIM), jnp.float32),                                   # post_attention_layernorm
    )

    x = jax.random.normal(ks[7], (B, S, DIM), jnp.float32)
    cache_k = jnp.zeros((MAX_BATCH, MAX_SEQ, KF), jnp.float32)
    cache_v = jnp.zeros((MAX_BATCH, MAX_SEQ, KF), jnp.float32)

    # causal mask for prefill (start_pos = 0): (S, start_pos + S)
    row = jnp.arange(S)[:, None]
    col = jnp.arange(START_POS + S)[None, :]
    mask = jnp.where(col > row + START_POS, -jnp.inf, 0.0).astype(jnp.float32)

    out, cache_k, cache_v = block_forward(x, params, START_POS, mask, cache_k, cache_v)
    out = jax.block_until_ready(out)
    jax.block_until_ready((cache_k, cache_v))

    # ---- correctness checks vs pure-JAX reference ----
    cos_half, sin_half = rope_half_tables(START_POS, S)
    ref = reference_block(x, params, mask, cos_half, sin_half)
    assert out.shape == (B, S, DIM)
    assert jnp.allclose(out, ref, rtol=2e-2, atol=2e-2), "output mismatch vs JAX reference"

    wq, wk, wv = params[0], params[1], params[2]
    n1 = params[7]
    xn_ref = x * jax.lax.rsqrt(jnp.mean(x * x, -1, keepdims=True) + NORM_EPS) * n1
    k_ref = _rope_ref(xn_ref @ wk, cos_half, sin_half)
    v_ref = xn_ref @ wv
    assert jnp.allclose(cache_k[:, :S], k_ref, rtol=2e-2, atol=2e-2), "cache_k mismatch"
    assert jnp.allclose(cache_v[:, :S], v_ref, rtol=2e-2, atol=2e-2), "cache_v mismatch"
    assert jnp.allclose(cache_k[:, S:], 0.0) and jnp.allclose(cache_v[:, S:], 0.0), \
        "untouched cache region was clobbered"

    print("KERNEL_OK")
</pallas_src>

<mosaic_0001>
module attributes {stable_mosaic.version = 11 : i64} {
  func.func @_block_kernel(%arg0: i32, %arg1: memref<8x32xf32, #tpu.memory_space<vmem>>, %arg2: memref<64x128xbf16, #tpu.memory_space<vmem>>, %arg3: memref<96x32xbf16, #tpu.memory_space<vmem>>, %arg4: memref<2x32xf32, #tpu.memory_space<vmem>>, %arg5: memref<8x128xf32, #tpu.memory_space<vmem>>, %arg6: memref<16x8xf32, #tpu.memory_space<vmem>>, %arg7: memref<2x16x16xf32, #tpu.memory_space<any>>, %arg8: memref<2x16x16xf32, #tpu.memory_space<any>>, %arg9: memref<8x32xf32, #tpu.memory_space<vmem>>, %arg10: memref<1x8x16xf32, #tpu.memory_space<vmem>>, %arg11: memref<1x8x16xf32, #tpu.memory_space<vmem>>) attributes {dimension_semantics = [#tpu.dimension_semantics<parallel>], iteration_bounds = array<i64: 2>, scalar_prefetch = 0 : i64, scratch_operands = 0 : i64, tpu.core_type = #tpu.core_type<tc>, window_params = [{transform_indices = @transform_0, window_bounds = array<i64: 8, 32>}, {pipeline_mode = #tpu.pipeline_mode<synchronous>, transform_indices = @transform_1, window_bounds = array<i64: 64, 128>}, {pipeline_mode = #tpu.pipeline_mode<synchronous>, transform_indices = @transform_2, window_bounds = array<i64: 96, 32>}, {pipeline_mode = #tpu.pipeline_mode<synchronous>, transform_indices = @transform_3, window_bounds = array<i64: 2, 32>}, {pipeline_mode = #tpu.pipeline_mode<synchronous>, transform_indices = @transform_4, window_bounds = array<i64: 8, 128>}, {pipeline_mode = #tpu.pipeline_mode<synchronous>, transform_indices = @transform_5, window_bounds = array<i64: 16, 8>}, {}, {}, {transform_indices = @transform_8, window_bounds = array<i64: 8, 32>}, {transform_indices = @transform_9, window_bounds = array<i64: 1, 8, 16>}, {transform_indices = @transform_10, window_bounds = array<i64: 1, 8, 16>}]} {
    %c0 = arith.constant 0 : index
    %c0_0 = arith.constant 0 : index
    %0 = vector.load %arg1[%c0, %c0_0] : memref<8x32xf32, #tpu.memory_space<vmem>>, vector<8x32xf32>
    %c0_1 = arith.constant 0 : index
    %c0_2 = arith.constant 0 : index
    %1 = vector.load %arg4[%c0_1, %c0_2] : memref<2x32xf32, #tpu.memory_space<vmem>>, vector<2x32xf32>
    %c0_3 = arith.constant 0 : index
    %c0_4 = arith.constant 0 : index
    %2 = vector.load %arg2[%c0_3, %c0_4] : memref<64x128xbf16, #tpu.memory_space<vmem>>, vector<64x128xbf16>
    %c0_5 = arith.constant 0 : index
    %c0_6 = arith.constant 0 : index
    %3 = vector.load %arg3[%c0_5, %c0_6] : memref<96x32xbf16, #tpu.memory_space<vmem>>, vector<96x32xbf16>
    %4 = vector.extract_strided_slice %2 {offsets = [0, 0], sizes = [32, 128], strides = [1, 1]} : vector<64x128xbf16> to vector<32x128xbf16>
    %5 = vector.extract_strided_slice %2 {offsets = [32, 0], sizes = [32, 128], strides = [1, 1]} : vector<64x128xbf16> to vector<32x128xbf16>
    %6 = vector.extract_strided_slice %3 {offsets = [0, 0], sizes = [32, 32], strides = [1, 1]} : vector<96x32xbf16> to vector<32x32xbf16>
    %7 = vector.extract_strided_slice %3 {offsets = [32, 0], sizes = [64, 32], strides = [1, 1]} : vector<96x32xbf16> to vector<64x32xbf16>
    %8 = vector.extract_strided_slice %1 {offsets = [0, 0], sizes = [1, 32], strides = [1, 1]} : vector<2x32xf32> to vector<1x32xf32>
    %9 = arith.mulf %0, %0 : vector<8x32xf32>
    %cst = arith.constant dense<0.000000e+00> : vector<8xf32>
    %10 = vector.multi_reduction <add>, %9, %cst [1] : vector<8x32xf32> to vector<8xf32>
    %11 = vector.shape_cast %10 : vector<8xf32> to vector<8x1xf32>
    %cst_7 = arith.constant 3.200000e+01 : f32
    %12 = vector.broadcast %cst_7 : f32 to vector<8x1xf32>
    %13 = arith.divf %11, %12 : vector<8x1xf32>
    %cst_8 = arith.constant 9.99999974E-6 : f32
    %14 = vector.broadcast %cst_8 : f32 to vector<8x1xf32>
    %15 = arith.addf %13, %14 : vector<8x1xf32>
    %16 = math.rsqrt %15 : vector<8x1xf32>
    %17 = vector.broadcast %16 : vector<8x1xf32> to vector<8x32xf32>
    %18 = arith.mulf %0, %17 : vector<8x32xf32>
    %19 = vector.broadcast %8 : vector<1x32xf32> to vector<8x32xf32>
    %20 = arith.mulf %18, %19 : vector<8x32xf32>
    %21 = arith.truncf %20 : vector<8x32xf32> to vector<8x32xbf16>
    %cst_9 = arith.constant dense<0.000000e+00> : vector<8x128xf32>
    %22 = tpu.matmul %21, %4, %cst_9 {dimension_numbers = #tpu.dot_dimension_numbers<[1], [0], [0], [1], [0, 0, 1, 1], [], []>} : vector<8x32xbf16>, vector<32x128xbf16>, vector<8x128xf32> -> vector<8x128xf32>
    %c0_10 = arith.constant 0 : index
    %c0_11 = arith.constant 0 : index
    %23 = vector.load %arg5[%c0_10, %c0_11] : memref<8x128xf32, #tpu.memory_space<vmem>>, vector<8x128xf32>
    %24 = arith.mulf %22, %23 : vector<8x128xf32>
    %c64_i32 = arith.constant 64 : i32
    %25 = tpu.dynamic_rotate %24 by %c64_i32 dim 1 : vector<8x128xf32>, i32 -> vector<8x128xf32>
    %26 = arith.addf %24, %25 : vector<8x128xf32>
    %27 = vector.extract_strided_slice %26 {offsets = [0, 32], sizes = [8, 16], strides = [1, 1]} : vector<8x128xf32> to vector<8x16xf32>
    %c0_12 = arith.constant 0 : index
    %c0_13 = arith.constant 0 : index
    %c0_14 = arith.constant 0 : index
    %28 = vector.load %arg10[%c0_12, %c0_13, %c0_14] : memref<1x8x16xf32, #tpu.memory_space<vmem>>, vector<1x8x16xf32>
    %29 = vector.shape_cast %28 : vector<1x8x16xf32> to vector<8x16xf32>
    %30 = vector.shape_cast %27 : vector<8x16xf32> to vector<1x8x16xf32>
    tpu.vector_store %arg10[%c0_12, %c0_13, %c0_14], %30 {strides = array<i32>} : memref<1x8x16xf32, #tpu.memory_space<vmem>>, vector<1x8x16xf32>,
    %31 = vector.extract_strided_slice %26 {offsets = [0, 48], sizes = [8, 16], strides = [1, 1]} : vector<8x128xf32> to vector<8x16xf32>
    %c0_15 = arith.constant 0 : index
    %c0_16 = arith.constant 0 : index
    %c0_17 = arith.constant 0 : index
    %32 = vector.load %arg11[%c0_15, %c0_16, %c0_17] : memref<1x8x16xf32, #tpu.memory_space<vmem>>, vector<1x8x16xf32>
    %33 = vector.shape_cast %32 : vector<1x8x16xf32> to vector<8x16xf32>
    %34 = vector.shape_cast %31 : vector<8x16xf32> to vector<1x8x16xf32>
    tpu.vector_store %arg11[%c0_15, %c0_16, %c0_17], %34 {strides = array<i32>} : memref<1x8x16xf32, #tpu.memory_space<vmem>>, vector<1x8x16xf32>,
    %35 = vector.extract_strided_slice %26 {offsets = [0, 0], sizes = [8, 8], strides = [1, 1]} : vector<8x128xf32> to vector<8x8xf32>
    %36 = vector.extract_strided_slice %26 {offsets = [0, 8], sizes = [8, 8], strides = [1, 1]} : vector<8x128xf32> to vector<8x8xf32>
    %37 = vector.extract_strided_slice %26 {offsets = [0, 16], sizes = [8, 8], strides = [1, 1]} : vector<8x128xf32> to vector<8x8xf32>
    %38 = vector.extract_strided_slice %26 {offsets = [0, 24], sizes = [8, 8], strides = [1, 1]} : vector<8x128xf32> to vector<8x8xf32>
    %39 = tpu.concatenate %35, %36 in 0 : vector<8x8xf32>, vector<8x8xf32> -> vector<16x8xf32>
    %40 = tpu.concatenate %37, %38 in 0 : vector<8x8xf32>, vector<8x8xf32> -> vector<16x8xf32>
    %41 = vector.shape_cast %39 : vector<16x8xf32> to vector<1x16x8xf32>
    %42 = vector.shape_cast %40 : vector<16x8xf32> to vector<1x16x8xf32>
    %43 = tpu.concatenate %41, %42 in 0 : vector<1x16x8xf32>, vector<1x16x8xf32> -> vector<2x16x8xf32>
    %44 = vector.extract_strided_slice %26 {offsets = [0, 32], sizes = [8, 8], strides = [1, 1]} : vector<8x128xf32> to vector<8x8xf32>
    %45 = vector.extract_strided_slice %26 {offsets = [0, 40], sizes = [8, 8], strides = [1, 1]} : vector<8x128xf32> to vector<8x8xf32>
    %46 = vector.shape_cast %44 : vector<8x8xf32> to vector<1x8x8xf32>
    %47 = vector.shape_cast %45 : vector<8x8xf32> to vector<1x8x8xf32>
    %48 = tpu.concatenate %46, %47 in 0 : vector<1x8x8xf32>, vector<1x8x8xf32> -> vector<2x8x8xf32>
    %49 = vector.extract_strided_slice %26 {offsets = [0, 48], sizes = [8, 8], strides = [1, 1]} : vector<8x128xf32> to vector<8x8xf32>
    %50 = vector.extract_strided_slice %26 {offsets = [0, 56], sizes = [8, 8], strides = [1, 1]} : vector<8x128xf32> to vector<8x8xf32>
    %51 = vector.shape_cast %49 : vector<8x8xf32> to vector<1x8x8xf32>
    %52 = vector.shape_cast %50 : vector<8x8xf32> to vector<1x8x8xf32>
    %53 = tpu.concatenate %51, %52 in 0 : vector<1x8x8xf32>, vector<1x8x8xf32> -> vector<2x8x8xf32>
    %54 = arith.truncf %43 : vector<2x16x8xf32> to vector<2x16x8xbf16>
    %55 = arith.truncf %48 : vector<2x8x8xf32> to vector<2x8x8xbf16>
    "tpu.trace_start"() <{level = 10 : i32, message = "gqd,gkd->gqk"}> : () -> ()
    %cst_18 = arith.constant dense<0.000000e+00> : vector<2x16x8xf32>
    %56 = tpu.matmul %54, %55, %cst_18 {dimension_numbers = #tpu.dot_dimension_numbers<[2], [2], [1], [1], [0, 0, 0, 1, 1, 1], [0], [0]>} : vector<2x16x8xbf16>, vector<2x8x8xbf16>, vector<2x16x8xf32> -> vector<2x16x8xf32>
    "tpu.trace_stop"() : () -> ()
    %cst_19 = arith.constant 0.353553385 : f32
    %57 = vector.broadcast %cst_19 : f32 to vector<2x16x8xf32>
    %58 = arith.mulf %56, %57 : vector<2x16x8xf32>
    %c0_20 = arith.constant 0 : index
    %c0_21 = arith.constant 0 : index
    %59 = vector.load %arg6[%c0_20, %c0_21] : memref<16x8xf32, #tpu.memory_space<vmem>>, vector<16x8xf32>
    %60 = vector.shape_cast %59 : vector<16x8xf32> to vector<1x16x8xf32>
    %61 = vector.broadcast %60 : vector<1x16x8xf32> to vector<2x16x8xf32>
    %62 = arith.addf %58, %61 : vector<2x16x8xf32>
    %cst_22 = arith.constant dense<0xFF800000> : vector<2x16xf32>
    %63 = vector.multi_reduction <maximumf>, %62, %cst_22 [2] : vector<2x16x8xf32> to vector<2x16xf32>
    %64 = vector.shape_cast %63 : vector<2x16xf32> to vector<2x16x1xf32>
    %65 = vector.broadcast %64 : vector<2x16x1xf32> to vector<2x16x8xf32>
    %66 = arith.subf %62, %65 : vector<2x16x8xf32>
    %67 = math.exp %66 : vector<2x16x8xf32>
    %cst_23 = arith.constant dense<0.000000e+00> : vector<2x16xf32>
    %68 = vector.multi_reduction <add>, %67, %cst_23 [2] : vector<2x16x8xf32> to vector<2x16xf32>
    %69 = vector.shape_cast %68 : vector<2x16xf32> to vector<2x16x1xf32>
    %70 = tpu.reciprocal %69 {approx = true} : vector<2x16x1xf32> -> vector<2x16x1xf32>
    %71 = vector.broadcast %70 : vector<2x16x1xf32> to vector<2x16x8xf32>
    %72 = arith.mulf %67, %71 : vector<2x16x8xf32>
    %73 = arith.truncf %72 : vector<2x16x8xf32> to vector<2x16x8xbf16>
    %74 = arith.truncf %53 : vector<2x8x8xf32> to vector<2x8x8xbf16>
    "tpu.trace_start"() <{level = 10 : i32, message = "gqk,gkd->gqd"}> : () -> ()
    %cst_24 = arith.constant dense<0.000000e+00> : vector<2x16x8xf32>
    %75 = tpu.matmul %73, %74, %cst_24 {dimension_numbers = #tpu.dot_dimension_numbers<[2], [1], [1], [2], [0, 0, 0, 1, 1, 2], [0], [0]>} : vector<2x16x8xbf16>, vector<2x8x8xbf16>, vector<2x16x8xf32> -> vector<2x16x8xf32>
    "tpu.trace_stop"() : () -> ()
    %76 = vector.extract_strided_slice %75 {offsets = [0, 0, 0], sizes = [1, 8, 8], strides = [1, 1, 1]} : vector<2x16x8xf32> to vector<1x8x8xf32>
    %77 = vector.shape_cast %76 : vector<1x8x8xf32> to vector<8x8xf32>
    %78 = vector.extract_strided_slice %75 {offsets = [0, 8, 0], sizes = [1, 8, 8], strides = [1, 1, 1]} : vector<2x16x8xf32> to vector<1x8x8xf32>
    %79 = vector.shape_cast %78 : vector<1x8x8xf32> to vector<8x8xf32>
    %80 = vector.extract_strided_slice %75 {offsets = [1, 0, 0], sizes = [1, 8, 8], strides = [1, 1, 1]} : vector<2x16x8xf32> to vector<1x8x8xf32>
    %81 = vector.shape_cast %80 : vector<1x8x8xf32> to vector<8x8xf32>
    %82 = vector.extract_strided_slice %75 {offsets = [1, 8, 0], sizes = [1, 8, 8], strides = [1, 1, 1]} : vector<2x16x8xf32> to vector<1x8x8xf32>
    %83 = vector.shape_cast %82 : vector<1x8x8xf32> to vector<8x8xf32>
    %84 = tpu.concatenate %77, %79, %81, %83 in 1 : vector<8x8xf32>, vector<8x8xf32>, vector<8x8xf32>, vector<8x8xf32> -> vector<8x32xf32>
    %85 = arith.truncf %84 : vector<8x32xf32> to vector<8x32xbf16>
    %cst_25 = arith.constant dense<0.000000e+00> : vector<8x32xf32>
    %86 = tpu.matmul %85, %6, %cst_25 {dimension_numbers = #tpu.dot_dimension_numbers<[1], [0], [0], [1], [0, 0, 1, 1], [], []>} : vector<8x32xbf16>, vector<32x32xbf16>, vector<8x32xf32> -> vector<8x32xf32>
    %87 = arith.addf %0, %86 : vector<8x32xf32>
    %88 = vector.extract_strided_slice %1 {offsets = [1, 0], sizes = [1, 32], strides = [1, 1]} : vector<2x32xf32> to vector<1x32xf32>
    %89 = arith.mulf %87, %87 : vector<8x32xf32>
    %cst_26 = arith.constant dense<0.000000e+00> : vector<8xf32>
    %90 = vector.multi_reduction <add>, %89, %cst_26 [1] : vector<8x32xf32> to vector<8xf32>
    %91 = vector.shape_cast %90 : vector<8xf32> to vector<8x1xf32>
    %cst_27 = arith.constant 3.200000e+01 : f32
    %92 = vector.broadcast %cst_27 : f32 to vector<8x1xf32>
    %93 = arith.divf %91, %92 : vector<8x1xf32>
    %cst_28 = arith.constant 9.99999974E-6 : f32
    %94 = vector.broadcast %cst_28 : f32 to vector<8x1xf32>
    %95 = arith.addf %93, %94 : vector<8x1xf32>
    %96 = math.rsqrt %95 : vector<8x1xf32>
    %97 = vector.broadcast %96 : vector<8x1xf32> to vector<8x32xf32>
    %98 = arith.mulf %87, %97 : vector<8x32xf32>
    %99 = vector.broadcast %88 : vector<1x32xf32> to vector<8x32xf32>
    %100 = arith.mulf %98, %99 : vector<8x32xf32>
    %101 = arith.truncf %100 : vector<8x32xf32> to vector<8x32xbf16>
    %cst_29 = arith.constant dense<0.000000e+00> : vector<8x128xf32>
    %102 = tpu.matmul %101, %5, %cst_29 {dimension_numbers = #tpu.dot_dimension_numbers<[1], [0], [0], [1], [0, 0, 1, 1], [], []>} : vector<8x32xbf16>, vector<32x128xbf16>, vector<8x128xf32> -> vector<8x128xf32>
    %c64_i32_30 = arith.constant 64 : i32
    %103 = tpu.dynamic_rotate %102 by %c64_i32_30 dim 1 : vector<8x128xf32>, i32 -> vector<8x128xf32>
    %104 = arith.mulf %102, %103 : vector<8x128xf32>
    %cst_31 = arith.constant 0.000000e+00 : f32
    %105 = vector.broadcast %cst_31 : f32 to vector<8x128xf32>
    %106 = arith.subf %105, %102 : vector<8x128xf32>
    %107 = math.exp %106 : vector<8x128xf32>
    %cst_32 = arith.constant 1.000000e+00 : f32
    %108 = vector.broadcast %cst_32 : f32 to vector<8x128xf32>
    %109 = arith.addf %108, %107 : vector<8x128xf32>
    %110 = tpu.reciprocal %109 {approx = true} : vector<8x128xf32> -> vector<8x128xf32>
    %111 = arith.mulf %104, %110 : vector<8x128xf32>
    %112 = vector.extract_strided_slice %111 {offsets = [0, 0], sizes = [8, 64], strides = [1, 1]} : vector<8x128xf32> to vector<8x64xf32>
    %113 = arith.truncf %112 : vector<8x64xf32> to vector<8x64xbf16>
    %cst_33 = arith.constant dense<0.000000e+00> : vector<8x32xf32>
    %114 = tpu.matmul %113, %7, %cst_33 {dimension_numbers = #tpu.dot_dimension_numbers<[1], [0], [0], [1], [0, 0, 1, 1], [], []>} : vector<8x64xbf16>, vector<64x32xbf16>, vector<8x32xf32> -> vector<8x32xf32>
    %115 = arith.addf %87, %114 : vector<8x32xf32>
    %c0_34 = arith.constant 0 : index
    %c0_35 = arith.constant 0 : index
    %116 = vector.load %arg9[%c0_34, %c0_35] : memref<8x32xf32, #tpu.memory_space<vmem>>, vector<8x32xf32>
    tpu.vector_store %arg9[%c0_34, %c0_35], %115 {strides = array<i32>} : memref<8x32xf32, #tpu.memory_space<vmem>>, vector<8x32xf32>,
    return
  }
  func.func @transform_0(%arg0: i32) -> (i32, i32) {
    %c0_i32 = arith.constant 0 : i32
    %c0_i32_0 = arith.constant 0 : i32
    return %arg0, %c0_i32 : i32, i32
  }
  func.func @transform_1(%arg0: i32) -> (i32, i32) {
    %c0_i32 = arith.constant 0 : i32
    %c0_i32_0 = arith.constant 0 : i32
    %c0_i32_1 = arith.constant 0 : i32
    return %c0_i32, %c0_i32_0 : i32, i32
  }
  func.func @transform_2(%arg0: i32) -> (i32, i32) {
    %c0_i32 = arith.constant 0 : i32
    %c0_i32_0 = arith.constant 0 : i32
    %c0_i32_1 = arith.constant 0 : i32
    return %c0_i32, %c0_i32_0 : i32, i32
  }
  func.func @transform_3(%arg0: i32) -> (i32, i32) {
    %c0_i32 = arith.constant 0 : i32
    %c0_i32_0 = arith.constant 0 : i32
    %c0_i32_1 = arith.constant 0 : i32
    return %c0_i32, %c0_i32_0 : i32, i32
  }
  func.func @transform_4(%arg0: i32) -> (i32, i32) {
    %c0_i32 = arith.constant 0 : i32
    %c0_i32_0 = arith.constant 0 : i32
    %c0_i32_1 = arith.constant 0 : i32
    return %c0_i32, %c0_i32_0 : i32, i32
  }
  func.func @transform_5(%arg0: i32) -> (i32, i32) {
    %c0_i32 = arith.constant 0 : i32
    %c0_i32_0 = arith.constant 0 : i32
    %c0_i32_1 = arith.constant 0 : i32
    return %c0_i32, %c0_i32_0 : i32, i32
  }
  func.func @transform_8(%arg0: i32) -> (i32, i32) {
    %c0_i32 = arith.constant 0 : i32
    %c0_i32_0 = arith.constant 0 : i32
    return %arg0, %c0_i32 : i32, i32
  }
  func.func @transform_9(%arg0: i32) -> (i32, i32, i32) {
    %c0_i32 = arith.constant 0 : i32
    %c0_i32_0 = arith.constant 0 : i32
    %c0_i32_1 = arith.constant 0 : i32
    return %arg0, %c0_i32, %c0_i32_0 : i32, i32, i32
  }
  func.func @transform_10(%arg0: i32) -> (i32, i32, i32) {
    %c0_i32 = arith.constant 0 : i32
    %c0_i32_0 = arith.constant 0 : i32
    %c0_i32_1 = arith.constant 0 : i32
    return %arg0, %c0_i32, %c0_i32_0 : i32, i32, i32
  }
}

</mosaic_0001>

<bundles_post_ra>
// kernel: tpu_custom_call.1
= control target key start
LH: loop header
LB: loop body
LE: loop exit
PB: predicated region body
PF: predicated region fallthrough
CT: control target
= control target key end

     0   :  { %s1527_s0 = inlined_call_operand.vmem [shape: f32[16,32], index: 0, kind: input, shape index: {}]   ;;  %s1528_s1 = inlined_call_operand.vmem [shape: bf16[64,128], index: 1, kind: input, shape index: {}]   ;;  %s1529_s2 = inlined_call_operand.vmem [shape: bf16[96,32], index: 2, kind: input, shape index: {}]   ;;  %s1530_s3 = inlined_call_operand.vmem [shape: f32[2,32], index: 3, kind: input, shape index: {}]   ;;  %s1531_s4 = inlined_call_operand.vmem [shape: f32[8,128], index: 4, kind: input, shape index: {}]   ;;  %s1532_s5 = inlined_call_operand.vmem [shape: f32[16,8], index: 5, kind: input, shape index: {}]   ;;  %s1533_s6 = inlined_call_operand.hbm [shape: f32[2,16,16], index: 6, kind: input, shape index: {}, may-alias: {6,9}]   ;;  %s1534_s7 = inlined_call_operand.hbm [shape: f32[2,16,16], index: 7, kind: input, shape index: {}, may-alias: {7,10}]   ;;  %s1535_s8 = inlined_call_operand.hbm [shape: f32[16,32], index: 8, kind: output, shape index: {0}]   ;;  %s1536_s9 = inlined_call_operand.hbm [shape: f32[2,16,16], index: 9, kind: output, shape index: {1}, may-alias: {6,9}]   ;;  %s1537_s10 = inlined_call_operand.hbm [shape: f32[2,16,16], index: 10, kind: output, shape index: {2}, may-alias: {7,10}]  }
   0x1   :  { %1540 = sst [smem:[#allocation9_spill]] %s1527_s0 }
   0x2   :  { %1541 = sst [smem:[#allocation10_spill]] %s1528_s1 }
   0x3   :  { %1542 = sst [smem:[#allocation11_spill]] %s1529_s2 }
   0x4   :  { %1543 = sst [smem:[#allocation12_spill]] %s1530_s3 }
   0x5   :  { %16 = vsyncpa [#allocation3], 0 }
   0x6   :  { %18 = vsyncpa [#allocation3 + $0x1], 0 }
   0x7   :  { %19 = vsyncpa [#allocation5], 0 }
   0x8   :  { %21 = vsyncpa [#allocation5 + $0x1], 0  ;;  %s1278_s13 = smov 0   ;;  %s1280_s14 = smov 0  }
   0x9   :  { %s1282_s6 = smov 0   ;;  %s1284_s7 = smov 0  }
   0xa LB: > { %s1299_s15 = sadd.s32 4294967295, %s1212_s7   ;;  %s1538_s16 = sadd.s32 4294967294, %s1212_s7   ;;  %s1212_s7 = sphi %s1284_s7, %s1555_s7   ;;  %s1208_s6 = sphi %s1282_s6, %s1554_s6   ;;  %s1204_s14 = sphi %s1280_s14, %s1553_s14   ;;  %s1200_s13 = sphi %s1278_s13, %s1552_s13  }
   0xb   : > { %s1303_s17 = sadd.s32 1, %s1212_s7   ;;  %s165_s18 = sadd.s32 1, %s1208_s6 }
   0xc   : > { %s162_s19 = ssub.s32 %s1212_s7, %s1303_s17  ;;  %p175_p0 = scmp.ne.s32.totalorder %s1208_s6, %s1204_s14 }
   0xd   : > { %p163_p1 = scmp.eq.s32.totalorder %s162_s19, 0  ;;  %p176_p2 = scmp.eq.s32.totalorder %s1299_s15, 1 }
   0xe   : > { %p181_p3 = scmp.ne.s32.totalorder %s1204_s14, %s1200_s13  ;;  %p182_p4 = scmp.eq.s32.totalorder %s1538_s16, 1 }
   0xf   : > { %s1316_s20 = scalar_select %p163_p1, %s1208_s6, %s165_s18  }
  0x10   : > { %p1318_p5 = por %p176_p2, %p175_p0  ;;  %p1322_p6 = por %p182_p4, %p181_p3 }
  0x11   : > { %p926_p7 = scmp.ge.s32.totalorder %s1212_s7, 1  ;;  %p274_p8 = scmp.lt.s32.totalorder %s1212_s7, 3 }
  0x13   : > { %p275_p9 = pnand %p926_p7, %p274_p8 }
  0x14   : > { %p317_p10 = scmp.lt.s32.totalorder (!%p275_p9), %s1299_s15, 1  ;;  %s1546_s0 = sld [smem:[#allocation9_spill]] (!%p275_p9) }
  0x15   : > { %278 = sbr.rel (%p275_p9) target bundleno = 1951 (0x79f), region = 44  ;;  %s1547_s1 = sld [smem:[#allocation10_spill]] (!%p275_p9) }
  0x16   : > { %s1548_s3 = sld [smem:[#allocation12_spill]] (!%p275_p9)  ;;  %s1216_s25 = smov (!%p275_p9), 120  }
  0x17   : > { %s1217_s26 = smov (!%p275_p9), 96   ;;  %s1219_s12 = smov (!%p275_p9), 80  }
  0x18   : > { %s1220_s18 = smov (!%p275_p9), 8   ;;  %s1221_s19 = smov (!%p275_p9), 16  }
  0x19   : > { %s1549_s2 = sld [smem:[#allocation11_spill]] (!%p275_p9) }
  0x1a   : > { %s318_s23 = scalar_select %p317_p10, %s1299_s15, 1  ;;  %vm345_vm0 = vcmask 261120   ;;  %v1214_v3 = vmov 32.0   ;;  %v400_v27 = vld [vmem:[%s1531_s4] sm:$0xff]  ;;  %vm436_vm5 = vcmask 64512   ;;  %v490_v60 = vld [vmem:[%s1532_s5 + $0x8] sm:$0xff] }
  0x1b   : > { %1064 = vrcp.f32 %v1214_v3  ;;  %v990_v7 = vld [vmem:[%s1547_s1 + $0x8] sm:$0xff]  ;;  %v989_v9 = vld [vmem:[%s1547_s1] sm:$0xff]  ;;  %vm553_vm6 = vcmask 1043456   ;;  %vm409_vm7 = vcmask 130048   ;;  %vm612_vm8 = vcmask 195584  }
  0x1c   : > { %s930_s24 = sshll.u32 %s318_s23, 3  ;;  %393 = vmatpush.bf16.msra.mxu0 %v990_v7  ;;  %v1350_v20 = vld [vmem:[%s1548_s3] sm:$0x3]  ;;  %s1222_s23 = smov 24   ;;  %vm726_vm12 = vcmask 523264  }
  0x1d   : > { %s320_s27 = scalar_lea.vmem %s1546_s0, %s930_s24  ;;  %v369_v22 = vperm.slane %v1350_v20, 0  ;;  %s1215_s24 = smov 64   ;;  %v489_v55 = vld [vmem:[%s1532_s5] sm:$0xff] }
  0x1e   : > { %v1333_v0 = vld [vmem:[%s320_s27] sm:$0xff]  ;;  %s1218_s27 = smov 112  }
  0x1f   : > { %v344_v1 = vmul.f32 %v1333_v0, %v1333_v0 }
  0x20   : > { %394 = vmatpush.bf16.msra.mxu0 %v989_v9 }
  0x21   : > { %v346_v2 = vsel %vm345_vm0, %v344_v1, 0.0  ;;  %v1065_v4 = vpop.eup %1064 }
  0x22   : > { %347 = vadd.xlane.f32.xlu0 %v346_v2  ;;  %v350_v5 = vmul.f32 32.0, %v1065_v4  ;;  %vm354_vm1 = vweird.f32 %v1065_v4 }
  0x24   : > { %v351_v6 = vsub.f32 1.0, %v350_v5 }
  0x26   : > { %v352_v8 = vmul.f32 %v1065_v4, %v351_v6 }
  0x28   : > { %v353_v10 = vadd.f32 %v1065_v4, %v352_v8 }
  0x2a   : > { %v1344_v11 = vsel %vm354_vm1, %v1065_v4, %v353_v10 }
  0x95   : > { %v348_v12 = vpop.xlane.xlu0 %347 }
  0x96   : > { %v356_v13 = vmul.f32 %v1344_v11, %v348_v12 }
  0x98   : > { %v357_v14 = vadd.f32 1e-05, %v356_v13 }
  0x9a   : > { %1066 = vrsqrt.f32 %v357_v14  ;;  %vm364_vm3 = vweird.f32 %v357_v14 }
  0xa0   : > { %v1067_v15 = vpop.eup %1066 }
  0xa1   : > { %v359_v16 = vmul.f32 %v1067_v15, %v357_v14  ;;  %vm365_vm2 = vweird.f32 %v1067_v15 }
  0xa2   : > { %vm366_vm4 = vmor %vm364_vm3, %vm365_vm2 }
  0xa3   : > { %v360_v17 = vmul.f32 %v1067_v15, %v359_v16 }
  0xa5   : > { %v361_v18 = vmul.f32 0.5, %v360_v17 }
  0xa7   : > { %v362_v19 = vsub.f32 1.5, %v361_v18 }
  0xa9   : > { %v363_v21 = vmul.f32 %v1067_v15, %v362_v19 }
  0xab   : > { %v367_v23 = vsel %vm366_vm4, %v1067_v15, %v363_v21 }
  0xac   : > { %v368_v24 = vmul.f32 %v367_v23, %v1333_v0 }
  0xae   : > { %v370_v25 = vmul.f32 %v369_v22, %v368_v24 }
  0xb0   : > { %v371_v26 = vpack.c.bf16 %v370_v25, %v370_v25 }
  0xb2   : > { %939 = vmatmul.msk.bf16.vlgmr.msra.gmra.mxu0 %vm345_vm0, %v371_v26 }
 0x12f   : > { %v396_v28 = vpop.f32.mrf.mxu0 }
 0x130   : > { %v401_v29 = vmul.f32 %v400_v27, %v396_v28 }
 0x132   : > { %402 = vrot.lane.b32.xlu0 %v401_v29, %s1215_s24 }
 0x137   : > { %v398_v30 = vpop.f32.mrf.mxu0 }
 0x1a4   : > { %v403_v31 = vpop.permute.xlu0 %402 }
 0x1a5   : > { %v1359_v32 = vadd.f32 %v403_v31, %v401_v29 }
 0x1a7   : > { %415 = vrot.lane.b32.xlu1 %v1359_v32, %s1216_s25  ;;  %v424_v33 = vpack.c.bf16 %v1359_v32, %v1359_v32 }
 0x1a9   : > { %v430_v34 = vunpack.c.l.b16 %v424_v33 }
 0x1ab   : > { %v1364_v35 = vpack.c.b16 %v430_v34, %v430_v34 }
 0x1af   : > { %434 = vrot.lane.b32.xlu1 %v1364_v35, %s1217_s26 }
 0x219   : > { %v416_v36 = vpop.permute.xlu1 %415 }
 0x21a   : > { %v425_v37 = vpack.c.bf16 %v416_v36, %v416_v36  ;;  %v1059_v42 = vpack.i.bf16 %v416_v36, %v1359_v32 }
 0x21c   : > { %v431_v38 = vunpack.c.l.b16 %v425_v37 }
 0x21e   : > { %v1368_v39 = vpack.c.b16 %v431_v38, %v431_v38  ;;  %v432_v43 = vpack.c.b16 %v431_v38, %v430_v34 }
 0x220   : > { %463 = vrot.lane.b32.xlu2 %v1368_v39, %s1217_s26 }
 0x221   : > { %v435_v40 = vpop.permute.xlu1 %434 }
 0x222   : > { %v441_v41 = vsel %vm436_vm5, %v435_v40, 0 }
 0x223   : > { %450 = vmatpush.bf16.xpose.msra.mxu1 %v441_v41 }
 0x228   : > { %1060 = vrot.lane.b32.xlu2 %v1059_v42, %s1218_s27 }
 0x22a   : > { %940 = vmatmul.msk.bf16.vlgmr.msra.gmra.mxu1 %vm436_vm5, %v432_v43 }
 0x27a   : > { %v464_v44 = vpop.permute.xlu2 %463 }
 0x27b   : > { %v469_v45 = vsel %vm436_vm5, %v464_v44, 0 }
 0x27c   : > { %478 = vmatpush.bf16.xpose.msra.mxu2 %v469_v45 }
 0x282   : > { %v1061_v46 = vpop.permute.xlu2 %1060 }
 0x283   : > { %v1063_v47 = vunpack.i.h.bf16 %v1061_v46  ;;  %v1062_v48 = vunpack.i.l.bf16 %v1061_v46 }
 0x285   : > { %v427_v49 = vpack.c.bf16 %v1063_v47, %v1063_v47  ;;  %v426_v50 = vpack.c.bf16 %v1062_v48, %v1062_v48 }
 0x287   : > { %v460_v51 = vunpack.c.l.b16 %v427_v49  ;;  %v459_v52 = vunpack.c.l.b16 %v426_v50 }
 0x289   : > { %v461_v53 = vpack.c.b16 %v460_v51, %v459_v52 }
 0x28b   : > { %941 = vmatmul.msk.bf16.vlgmr.msra.gmra.mxu2 %vm436_vm5, %v461_v53 }
 0x2a7   : > { %v452_v54 = vpop.f32.mrf.mxu1 }
 0x2a8   : > { %v485_v56 = vmul.f32 0.35355338, %v452_v54 }
 0x2aa   : > { %v491_v57 = vadd.f32 %v489_v55, %v485_v56 }
 0x2ac   : > { %v495_v58 = vsel %vm436_vm5, %v491_v57, -inf }
 0x2ad   : > { %496 = vmax.xlane.f32.xlu1 %v495_v58 }
 0x2af   : > { %v454_v59 = vpop.f32.mrf.mxu1 }
 0x2b0   : > { %v486_v61 = vmul.f32 0.35355338, %v454_v59 }
 0x2b2   : > { %v492_v62 = vadd.f32 %v490_v60, %v486_v61 }
 0x2b4   : > { %v498_v63 = vsel %vm436_vm5, %v492_v62, -inf }
 0x2b5   : > { %499 = vmax.xlane.f32.xlu2 %v498_v63  ;;  %v993_v63 = vld [vmem:[%s1549_s2] sm:$0xff] }
 0x30e   : > { %v480_v1 = vpop.f32.mrf.mxu2 }
 0x30f   : > { %v487_v2 = vmul.f32 0.35355338, %v480_v1 }
 0x311   : > { %v493_v3 = vadd.f32 %v489_v55, %v487_v2 }
 0x313   : > { %v501_v4 = vsel %vm436_vm5, %v493_v3, -inf }
 0x314   : > { %502 = vmax.xlane.f32.xlu0 %v501_v4 }
 0x316   : > { %v482_v5 = vpop.f32.mrf.mxu2 }
 0x317   : > { %v488_v6 = vmul.f32 0.35355338, %v482_v5 }
 0x319   : > { %v494_v7 = vadd.f32 %v490_v60, %v488_v6 }
 0x31b   : > { %v504_v8 = vsel %vm436_vm5, %v494_v7, -inf }
 0x31c   : > { %505 = vmax.xlane.f32.xlu2 %v504_v8 }
 0x320   : > { %v497_v9 = vpop.xlane.xlu1 %496 }
 0x321   : > { %v507_v10 = vsub.f32 %v491_v57, %v497_v9 }
 0x323   : > { %v511_v12 = vmul.f32 1.442695, %v507_v10 }
 0x325   : > { %1068 = vpow2.f32 %v511_v12 }
 0x328   : > { %v500_v13 = vpop.xlane.xlu2 %499 }
 0x329   : > { %v508_v14 = vsub.f32 %v492_v62, %v500_v13  ;;  %v994_v62 = vld [vmem:[%s1549_s2 + $0x8] sm:$0xff] }
 0x32a   : > { %636 = vmatpush.bf16.msrb.mxu0 %v994_v62 }
 0x32b   : > { %v1069_v15 = vpop.eup %1068  ;;  %v513_v16 = vmul.f32 1.442695, %v508_v14 }
 0x32c   : > { %v519_v17 = vsel %vm436_vm5, %v1069_v15, 0.0 }
 0x32d   : > { %1070 = vpow2.f32 %v513_v16  ;;  %520 = vadd.xlane.f32.xlu1 %v519_v17  ;;  %v991_v16 = vld [vmem:[%s1547_s1 + $0x10] sm:$0xff] }
 0x32e   : > { %637 = vmatpush.bf16.msrb.mxu0 %v993_v63 }
 0x333   : > { %v1071_v18 = vpop.eup %1070 }
 0x334   : > { %v522_v19 = vsel %vm436_vm5, %v1071_v18, 0.0 }
 0x335   : > { %523 = vadd.xlane.f32.xlu2 %v522_v19 }
 0x346   : > { %548 = vrot.lane.b32.xlu1 %v1364_v35, %s1219_s12 }
 0x387   : > { %v503_v21 = vpop.xlane.xlu0 %502 }
 0x388   : > { %v509_v22 = vsub.f32 %v493_v3, %v503_v21 }
 0x38a   : > { %v515_v23 = vmul.f32 1.442695, %v509_v22 }
 0x38c   : > { %1072 = vpow2.f32 %v515_v23 }
 0x38f   : > { %v506_v24 = vpop.xlane.xlu2 %505 }
 0x390   : > { %v510_v25 = vsub.f32 %v494_v7, %v506_v24 }
 0x392   : > { %v1073_v26 = vpop.eup %1072  ;;  %v517_v27 = vmul.f32 1.442695, %v510_v25 }
 0x393   : > { %v525_v28 = vsel %vm436_vm5, %v1073_v26, 0.0 }
 0x394   : > { %1074 = vpow2.f32 %v517_v27  ;;  %526 = vadd.xlane.f32.xlu0 %v525_v28 }
 0x39a   : > { %v1075_v29 = vpop.eup %1074 }
 0x39b   : > { %v528_v30 = vsel %vm436_vm5, %v1075_v29, 0.0 }
 0x39c   : > { %529 = vadd.xlane.f32.xlu2 %v528_v30 }
 0x3a0   : > { %v521_v31 = vpop.xlane.xlu1 %520 }
 0x3a1   : > { %1076 = vrcp.f32 %v521_v31  ;;  %v997_v31 = vld [vmem:[%s1549_s2 + $0x20] sm:$0xff] }
 0x3a7   : > { %v1077_v34 = vpop.eup %1076 }
 0x3a8   : > { %576 = vrot.lane.b32.xlu0 %v1368_v39, %s1219_s12  ;;  %v524_v33 = vpop.xlane.xlu2 %523  ;;  %v535_v37 = vmul.f32 %v1077_v34, %v1069_v15  ;;  %v992_v15 = vld [vmem:[%s1547_s1 + $0x18] sm:$0xff] }
 0x3a9   : > { %1078 = vrcp.f32 %v524_v33  ;;  %685 = vmatpush.bf16.msrb.mxu1 %v992_v15 }
 0x3aa   : > { %v539_v40 = vpack.c.bf16 %v535_v37, %v535_v37 }
 0x3ac   : > { %v545_v44 = vunpack.c.l.b16 %v539_v40 }
 0x3ad   : > { %686 = vmatpush.bf16.msrb.mxu1 %v991_v16 }
 0x3af   : > { %v1079_v35 = vpop.eup %1078 }
 0x3b0   : > { %v536_v36 = vmul.f32 %v1079_v35, %v1071_v18  ;;  %v995_v35 = vld [vmem:[%s1549_s2 + $0x10] sm:$0xff] }
 0x3b2   : > { %v540_v38 = vpack.c.bf16 %v536_v36, %v536_v36 }
 0x3b4   : > { %v546_v41 = vunpack.c.l.b16 %v540_v38 }
 0x3b6   : > { %v547_v45 = vpack.c.b16 %v546_v41, %v545_v44 }
 0x3b8   : > { %v549_v42 = vpop.permute.xlu1 %548 }
 0x3b9   : > { %v555_v43 = vsel %vm553_vm6, %v549_v42, 0 }
 0x3ba   : > { %564 = vmatpush.bf16.msra.mxu3 %v555_v43 }
 0x3bd   : > { %942 = vmatmul.msk.bf16.vlgmr.msra.gmra.mxu3 %vm436_vm5, %v547_v45 }
 0x407   : > { %v527_v46 = vpop.xlane.xlu0 %526 }
 0x408   : > { %1080 = vrcp.f32 %v527_v46 }
 0x40e   : > { %v1081_v47 = vpop.eup %1080 }
 0x40f   : > { %v530_v39 = vpop.xlane.xlu2 %529  ;;  %v537_v48 = vmul.f32 %v1081_v47, %v1073_v26  ;;  %v661_v26 = vperm.slane %v1350_v20, 1  ;;  %v996_v20 = vld [vmem:[%s1549_s2 + $0x18] sm:$0xff] }
 0x410   : > { %1082 = vrcp.f32 %v530_v39 }
 0x411   : > { %v541_v50 = vpack.c.bf16 %v537_v48, %v537_v48 }
 0x413   : > { %v573_v54 = vunpack.c.l.b16 %v541_v50 }
 0x416   : > { %v1083_v49 = vpop.eup %1082 }
 0x417   : > { %v538_v51 = vmul.f32 %v1083_v49, %v1075_v29 }
 0x419   : > { %v542_v52 = vpack.c.bf16 %v538_v51, %v538_v51 }
 0x41a   : > { %v577_v53 = vpop.permute.xlu0 %576 }
 0x41b   : > { %v574_v55 = vunpack.c.l.b16 %v542_v52  ;;  %v582_v56 = vsel %vm553_vm6, %v577_v53, 0 }
 0x41c   : > { %591 = vmatpush.bf16.msrb.mxu3 %v582_v56 }
 0x41d   : > { %v575_v57 = vpack.c.b16 %v574_v55, %v573_v54 }
 0x41f   : > { %943 = vmatmul.msk.bf16.vlgmr.msrb.gmra.mxu3 %vm436_vm5, %v575_v57 }
 0x440   : > { %v566_v58 = vpop.f32.mrf.mxu3 }
 0x448   : > { %v568_v59 = vpop.f32.mrf.mxu3 }
 0x449   : > { %599 = vrot.lane.b32.xlu2 %v568_v59, %s1220_s18 }
 0x4a2   : > { %v593_v60 = vpop.f32.mrf.mxu3 }
 0x4a3   : > { %603 = vrot.lane.b32.xlu1 %v593_v60, %s1221_s19  ;;  %v600_v1 = vpop.permute.xlu2 %599  ;;  %s750_s19 = sand.u32 1, %s1299_s15  }
 0x4a4   : > { %v610_v3 = vsel %vm436_vm5, %v566_v58, %v600_v1  ;;  %s1464_s1 = scalar_lea.sflag [#allocation5], %s750_s19 }
 0x4aa   : > { %v595_v61 = vpop.f32.mrf.mxu3 }
 0x4ab   : > { %607 = vrot.lane.b32.xlu0 %v595_v61, %s1222_s23 }
 0x4b3   : > { %406 = vrot.lane.b32.xlu0 %v1359_v32, %s1217_s26  ;;  %s1539_s26 = sand.u32 1, %s1204_s14  }
 0x4b4   : > { %s1412_s30 = sshll.u32 %s1539_s26, 3 }
 0x4b5   : > { %s309_s11 = scalar_lea.vmem [#allocation4], %s1412_s30 }
 0x4b6   : > { %s783_s23 = sshll.u32 %s309_s11, 4  ;;  %s784_s23 = int_to_ptr.vmem [resolvable:$true] %s783_s23 }
 0x515   : > { %v604_v2 = vpop.permute.xlu1 %603 }
 0x516   : > { %v611_v4 = vsel %vm409_vm7, %v610_v3, %v604_v2 }
 0x51d   : > { %v608_v5 = vpop.permute.xlu0 %607 }
 0x51e   : > { %v613_v6 = vsel %vm612_vm8, %v611_v4, %v608_v5 }
 0x51f   : > { %v614_v7 = vpack.c.bf16 %v613_v6, %v613_v6 }
 0x521   : > { %952 = vmatmul.msk.bf16.vlgmr.msrb.gmra.mxu0 %vm345_vm0, %v614_v7 }
 0x525   : > { %v407_v8 = vpop.permute.xlu0 %406 }
 0x526   : > { %410 = vst.msk [vmem:[%s309_s11] sm:$0xff] %vm409_vm7, %v407_v8 }
 0x59e   : > { %v639_v9 = vpop.f32.mrf.mxu0 }
 0x59f   : > { %v1420_v10 = vadd.f32 %v639_v9, %v1333_v0 }
 0x5a1   : > { %v644_v12 = vmul.f32 %v1420_v10, %v1420_v10 }
 0x5a3   : > { %v645_v13 = vsel %vm345_vm0, %v644_v12, 0.0 }
 0x5a4   : > { %646 = vadd.xlane.f32.xlu1 %v645_v13 }
 0x5a6   : > { %v641_v14 = vpop.f32.mrf.mxu0 }
 0x617   : > { %v647_v17 = vpop.xlane.xlu1 %646 }
 0x618   : > { %v648_v0 = vmul.f32 %v647_v17, %v1344_v11  ;;  %v998_v11 = vld [vmem:[%s1549_s2 + $0x28] sm:$0xff] }
 0x619   : > { %734 = vmatpush.bf16.msrb.mxu2 %v998_v11 }
 0x61a   : > { %v649_v18 = vadd.f32 1e-05, %v648_v0 }
 0x61c   : > { %1084 = vrsqrt.f32 %v649_v18  ;;  %vm656_vm10 = vweird.f32 %v649_v18 }
 0x61d   : > { %735 = vmatpush.bf16.msrb.mxu2 %v997_v31 }
 0x621   : > { %736 = vmatpush.bf16.msrb.mxu2 %v996_v20 }
 0x622   : > { %v1085_v19 = vpop.eup %1084 }
 0x623   : > { %v651_v21 = vmul.f32 %v1085_v19, %v649_v18  ;;  %vm657_vm9 = vweird.f32 %v1085_v19 }
 0x624   : > { %vm658_vm11 = vmor %vm656_vm10, %vm657_vm9 }
 0x625   : > { %v652_v22 = vmul.f32 %v1085_v19, %v651_v21  ;;  %737 = vmatpush.bf16.msrb.mxu2 %v995_v35 }
 0x627   : > { %v653_v23 = vmul.f32 0.5, %v652_v22 }
 0x629   : > { %v654_v24 = vsub.f32 1.5, %v653_v23 }
 0x62b   : > { %v655_v25 = vmul.f32 %v1085_v19, %v654_v24 }
 0x62d   : > { %v659_v27 = vsel %vm658_vm11, %v1085_v19, %v655_v25 }
 0x62e   : > { %v660_v28 = vmul.f32 %v659_v27, %v1420_v10 }
 0x630   : > { %v662_v29 = vmul.f32 %v661_v26, %v660_v28 }
 0x632   : > { %v663_v30 = vpack.c.bf16 %v662_v29, %v662_v29 }
 0x634   : > { %961 = vmatmul.msk.bf16.vlgmr.msrb.gmra.mxu1 %vm345_vm0, %v663_v30 }
 0x6b1   : > { %v688_v33 = vpop.f32.mrf.mxu1 }
 0x6b2   : > { %692 = vrot.lane.b32.xlu2 %v688_v33, %s1215_s24  ;;  %v695_v36 = vsub.f32 0.0, %v688_v33  ;;  %s316_s24 = scalar_lea.vmem [#allocation6], %s1412_s30 }
 0x6b3   : > { %s1459_s25 = sshll.u32 %s316_s24, 4  ;;  %s799_s25 = int_to_ptr.vmem [resolvable:$true] %s1459_s25 }
 0x6b4   : > { %v696_v37 = vmul.f32 1.442695, %v695_v36 }
 0x6b6   : > { %1086 = vpow2.f32 %v696_v37 }
 0x6b9   : > { %v690_v34 = vpop.f32.mrf.mxu1 }
 0x6ba   : > { %411 = vrot.lane.b32.xlu2 %v1359_v32, %s1219_s12  ;;  %s999_s12 = sshll.u32 %s1299_s15, 4 }
 0x6bb   : > { %s781_s18 = scalar_lea.hbm %s1536_s9, %s999_s12  ;;  %s796_s0 = scalar_lea.hbm %s1537_s10, %s999_s12 }
 0x6bc   : > { %v1087_v38 = vpop.eup %1086  ;;  %s785_s27 = sshll.u32 %s781_s18, 4  ;;  %s786_s27 = int_to_ptr.hbm [resolvable:$true] %s785_s27 }
 0x6bd   : > { %v698_v40 = vadd.f32 1.0, %v1087_v38  ;;  %s1104_s2 = sshra.s32 %s786_s27, 4  ;;  %s1105_s2 = int_to_ptr.hbm [resolvable:$true] %s1104_s2 }
 0x6be   : > { %s1106_s3 = scalar_lea.hbm %s1105_s2, 8  ;;  %p1111_p0 = scmp.lt.s32.totalorder %s1105_s2, %s1536_s9 }
 0x6bf   : > { %1088 = vrcp.f32 %v698_v40  ;;  %p1107_p11 = scmp.ne.s32.totalorder %s1105_s2, %s1106_s3 }
 0x6c1   : > { %p1108_p12 = pnand %p1107_p11, %p1318_p5 }
 0x6c3   : > { %p1109_p13 = pneg %p1108_p12 }
 0x6c5   : > { %v1089_v43 = vpop.eup %1088 }
 0x70c   : > { %v693_v41 = vpop.permute.xlu2 %692 }
 0x70d   : > { %v694_v42 = vmul.f32 %v693_v41, %v688_v33 }
 0x70f   : > { %v700_v44 = vmul.f32 %v1089_v43, %v694_v42 }
 0x711   : > { %v701_v32 = vpack.c.bf16 %v700_v44, %v700_v44 }
 0x713   : > { %978 = vmatmul.msk.bf16.vlgmr.msrb.gmra.mxu2 %vm726_vm12, %v701_v32 }
 0x714   : > { %v412_v45 = vpop.permute.xlu2 %411 }
 0x715   : > { %414 = vst.msk [vmem:[%s316_s24] sm:$0xff] %vm409_vm7, %v412_v45  ;;  %s1110_s24 = scalar_lea.hbm %s1536_s9, 32 }
 0x716   : > { %p1112_p1 = scmp.lt.s32.totalorder %s1110_s24, %s1106_s3 }
 0x718   : > { %p1113_p2 = por %p1112_p1, %p1111_p0 }
 0x71a   : > { %p1114_p3 = pnand %p1113_p2, %p1109_p13 }
 0x71c   : > { %1117 = shalt.err (!%p1114_p3)
}
 0x71d   : > { %1002 = dma.vmem_to_hbm [thread:$0]  (%p1318_p5), %s784_s23, 128, %s786_s27, %s1464_s1  }
 0x71e   : > { %s800_s16 = sshll.u32 %s796_s0, 4  ;;  %s1138_s19 = scalar_lea.hbm %s1537_s10, 32  ;;  %s801_s16 = int_to_ptr.hbm [resolvable:$true] %s800_s16 }
 0x71f   : > { %s1132_s26 = sshra.s32 %s801_s16, 4  ;;  %s1133_s26 = int_to_ptr.hbm [resolvable:$true] %s1132_s26 }
 0x720   : > { %s1134_s12 = scalar_lea.hbm %s1133_s26, 8  ;;  %p1139_p9 = scmp.lt.s32.totalorder %s1133_s26, %s1537_s10 }
 0x721   : > { %p1135_p4 = scmp.ne.s32.totalorder %s1133_s26, %s1134_s12  ;;  %p1140_p10 = scmp.lt.s32.totalorder %s1138_s19, %s1134_s12 }
 0x723   : > { %p1136_p7 = pnand %p1135_p4, %p1318_p5  ;;  %p1141_p11 = por %p1140_p10, %p1139_p9 }
 0x725   : > { %p1137_p8 = pneg %p1136_p7 }
 0x727   : > { %p1142_p12 = pnand %p1141_p11, %p1137_p8 }
 0x729   : > { %1145 = shalt.err (!%p1142_p12)
}
 0x72a   : > { %1003 = dma.vmem_to_hbm [thread:$0]  (%p1318_p5), %s799_s25, 128, %s801_s16, %s1464_s1  }
 0x72b   : > { %s982_s0 = sshll.u32 %s1299_s15, 3  ;;  %s302_s29 = scalar_lea.vmem [#allocation2], %s1412_s30 }
 0x72c   : > { %s766_s24 = scalar_lea.hbm %s1535_s8, %s982_s0  ;;  %s768_s18 = sshll.u32 %s302_s29, 4  ;;  %s769_s18 = int_to_ptr.vmem [resolvable:$true] %s768_s18 }
 0x72d   : > { %s770_s26 = sshll.u32 %s766_s24, 4  ;;  %s1550_s12 = sand.u32 1, %s1204_s14   ;;  %s771_s26 = int_to_ptr.hbm [resolvable:$true] %s770_s26 }
 0x72e   : > { %s746_s2 = scalar_lea.sflag [#allocation3], %s1550_s12  ;;  %s1160_s3 = sshra.s32 %s771_s26, 4  ;;  %s1161_s3 = int_to_ptr.hbm [resolvable:$true] %s1160_s3 }
 0x72f   : > { %s1162_s1 = scalar_lea.hbm %s1161_s3, 8  ;;  %s1166_s25 = scalar_lea.hbm %s1535_s8, 16 }
 0x730   : > { %p1163_p13 = scmp.ne.s32.totalorder %s1161_s3, %s1162_s1  ;;  %p1167_p2 = scmp.lt.s32.totalorder %s1161_s3, %s1535_s8 }
 0x731   : > { %p1168_p3 = scmp.lt.s32.totalorder %s1166_s25, %s1162_s1 }
 0x732   : > { %p1164_p0 = pnand %p1163_p13, %p1318_p5 }
 0x733   : > { %p1169_p4 = por %p1168_p3, %p1167_p2 }
 0x734   : > { %p1165_p1 = pneg %p1164_p0 }
 0x736   : > { %p1170_p7 = pnand %p1169_p4, %p1165_p1 }
 0x796   : > { %v739_v46 = vpop.f32.mrf.mxu2 }
 0x797   : > { %v743_v39 = vadd.f32 %v739_v46, %v1420_v10 }
 0x799   : > { %744 = vst.msk [vmem:[%s302_s29] sm:$0xff] %vm345_vm0, %v743_v39 }
 0x79a   : > { %1173 = shalt.err (!%p1170_p7)
}
 0x79b   : > { %1001 = dma.vmem_to_hbm [thread:$0]  (%p1318_p5), %s769_s18, 128, %s771_s26, %s746_s2  }
 0x79e   : > { %v741_v47 = vpop.f32.mrf.mxu2 }
 0x79f PF: > { %p1017_p8 = scmp.ge.s32.totalorder %s1212_s7, 2  ;;  %s812_s28 = sand.u32 1, %s1200_s13  }
 0x7a0   : > { %s813_s11 = scalar_lea.sflag [#allocation3], %s812_s28 }
 0x7a1   : > { %p1008_p9 = pnand %p1017_p8, %p1322_p6 }
 0x7a3   : > { %p1009_p10 = pneg %p1008_p9 }
 0x7a5   : > { %1191 = dma.done.wait (%p1009_p10), %s813_s11, 128  }
 0x7a6   : > { %1193 = vsyncadd (%p1009_p10), %s813_s11, 4294967168  ;;  %s1551_s0 = sadd.s32 4294967294, %s1212_s7  }
 0x7a7   : > { %s822_s23 = sand.u32 1, %s1551_s0  }
 0x7a8   : > { %s823_s27 = scalar_lea.sflag [#allocation5], %s822_s23 }
 0x7a9   : > { %1195 = dma.done.wait (%p1009_p10), %s823_s27, 256  }
 0x7aa   : > { %1197 = vsyncadd (%p1009_p10), %s823_s27, 4294967040  ;;  %p24_p5 = scmp.ge.s32.totalorder %s1303_s17, 4   ;;  %s1552_s13 = smov %s1204_s14 }
 0x7ab   : > { %s1553_s14 = smov %s1208_s6  ;;  %s1554_s6 = smov %s1316_s20 }
 0x7ac   : > { %s1555_s7 = smov %s1303_s17  ;;  %26 = sbr.rel (!%p24_p5) target bundleno = 10 (0xa), region = 111 }
 0x7b1   :  { %839 = vsyncpa [#allocation3], 1 }
 0x7b2   :  { %841 = vsyncpa [#allocation3 + $0x1], 1 }
 0x7b3   :  { %842 = vsyncpa [#allocation5], 1 }
 0x7b4   :  { %844 = vsyncpa [#allocation5 + $0x1], 1 }

</bundles_post_ra>
